<compile_context>
chip_gen: v6e
topology: v6e:2x2x1
jax: 0.10.0
libtpu: 0.0.40
codegen_flags: <defaults>
</compile_context>

<pallas_src>
import jax
import jax.numpy as jnp
from jax.experimental import pallas as pl
from jax.experimental.pallas import tpu as pltpu


# Rows of x (B*S) below which the wrapper just returns x @ W + b: at tiny
# shapes the pallas_call launch cost + fusion barrier dominate and plain XLA
# fuses the small GEMM+bias into neighbouring ops.
_SMALL_M_FALLBACK = 4096

# Pipeline depth for the streamed x / out tiles.  2 = standard double
# buffering.  3 can hide DMA issue latency / step jitter and is worth a sweep,
# but is left off by default per the review ("keep only if it measures").
_PIPELINE_DEPTH = 2


def _linear_kernel(x_ref, w_ref, b_ref, o_ref):
    # One MXU pass with f32 accumulation + VPU bias add, entirely in VMEM.
    acc = jnp.dot(x_ref[...], w_ref[...], preferred_element_type=jnp.float32)
    o_ref[...] = (acc + b_ref[...]).astype(o_ref.dtype)


def _block_spec(shape, index_map, n_buf):
    """BlockSpec with optional deeper pipelining (falls back if unsupported)."""
    if n_buf > 2:
        try:
            return pl.BlockSpec(shape, index_map, pipeline_mode=pl.Buffered(n_buf))
        except TypeError:  # older jax without pipeline_mode kwarg
            pass
    return pl.BlockSpec(shape, index_map)


def _choose_pack(num_rows, input_dim, d_model, *, lane_target=256,
                 max_weight_bytes=2 << 20, itemsize=4):
    """Rows-per-packed-row so the output (and ideally the input) are lane-dense.

    Picks the smallest pack with (pack * d_model) % 128 == 0, preferring packs
    that also make pack * input_dim a multiple of `lane_target` (256 fills a
    v6e/v7x MXU pass; 128 already fills v5e's 128x128 MXU), subject to
    num_rows % pack == 0 and a cap on the block-diagonal weight size.
    """
    if d_model % 128 == 0:
        return 1  # already lane-dense
    best, best_score = 1, -1
    for pack in range(2, 65):
        if num_rows % pack:
            continue
        if (pack * d_model) % 128:
            continue
        if pack * pack * input_dim * d_model * itemsize > max_weight_bytes:
            break  # weight grows monotonically with pack
        kp = pack * input_dim
        score = 2 if kp % lane_target == 0 else (1 if kp % 128 == 0 else 0)
        if score > best_score:
            best, best_score = pack, score
        if score == 2:
            break
    return best


def prepare_time_embedding_params(weight, bias, num_rows):
    """One-time packing of nn.Linear params (hoisted out of the per-step path).

    Returns (pack, w_packed, b_packed).  With pack > 1, `pack` consecutive
    rows of x are concatenated along K and multiplied by the block-diagonal
    weight kron(I_pack, W); the result is a contiguous relabel of y = x@W+b.
    """
    input_dim, d_model = weight.shape
    pack = _choose_pack(num_rows, input_dim, d_model)
    if pack > 1:
        w_in = jnp.kron(jnp.eye(pack, dtype=weight.dtype), weight)
        b_in = jnp.tile(bias, pack).reshape(1, pack * d_model)
    else:
        w_in = weight
        b_in = bias.reshape(1, d_model)
    return pack, w_in, b_in


def _pick_tile_m(m_rows, kp, npk, itemsize, *, budget_bytes=12 << 20,
                 tm_cap=4096, min_split_bytes=4 << 20):
    """Largest multiple-of-8 row tile within a conservative VMEM budget.

    Guarantees >= 2 grid steps once the streamed bytes are large enough so that
    dimension_semantics=('parallel',) can shard the axis across v7x's two
    TensorCores (a single-step grid leaves the second TC idle).
    """
    per_row = 2 * (kp + npk) * itemsize  # double-buffered x tile + out tile
    tm = int(min(budget_bytes // max(per_row, 1), tm_cap))
    tm = max((tm // 8) * 8, 8)
    if m_rows <= tm:
        if m_rows >= 16 and m_rows * (kp + npk) * itemsize >= min_split_bytes:
            half = (((m_rows + 1) // 2 + 7) // 8) * 8   # >=2 tiles, mult of 8
            return max(min(half, tm), 8)
        return m_rows  # full extent -> always a legal block shape
    return tm


def time_embedding(x, weight, bias, *, packed=None, force_pallas=False):
    """y = x @ weight + bias  (same semantics as nn.Linear, W pre-transposed).

    x:      (B, S, input_dim)    float32
    weight: (input_dim, d_model) float32  (PyTorch proj.weight.T)
    bias:   (d_model,)           float32
    packed: optional result of prepare_time_embedding_params (hoisted packing)
    returns (B, S, d_model)      float32
    """
    B, S, input_dim = x.shape
    d_model = weight.shape[1]
    M = B * S
    itemsize = jnp.dtype(x.dtype).itemsize

    # Tiny problems: plain XLA fuses the GEMM+bias into neighbouring ops and
    # beats the fixed pallas_call launch cost on every TPU generation.
    if M < _SMALL_M_FALLBACK and not force_pallas:
        return x @ weight + bias

    if packed is None:
        # NOTE: callers should hoist this to module setup via
        # prepare_time_embedding_params; doing it per call costs extra
        # un-fused wrapper-side XLA ops.
        packed = prepare_time_embedding_params(weight, bias, M)
    pack, w_in, b_in = packed
    if M % pack != 0:
        # Prepared pack incompatible with this batch; fall back to unpacked.
        pack, w_in, b_in = 1, weight, bias.reshape(1, d_model)

    x2d = x.reshape(M, input_dim)
    if pack > 1:
        m_rows = M // pack
        kp, npk = pack * input_dim, pack * d_model
        x_in = x2d.reshape(m_rows, kp)          # contiguous relabel: free
    else:
        m_rows, kp, npk = M, input_dim, d_model
        x_in = x2d

    tm = _pick_tile_m(m_rows, kp, npk, itemsize)
    grid_steps = -(-m_rows // tm)
    n_buf = _PIPELINE_DEPTH if grid_steps >= 3 else 2

    # Honest (packed) cost: real MXU work is pack x the dense flop count and
    # the resident weight block is pack^2 x larger.
    cost = pl.CostEstimate(
        flops=2 * m_rows * kp * npk,
        transcendentals=0,
        bytes_accessed=itemsize * (m_rows * kp + kp * npk + npk + m_rows * npk),
    )

    # Actually-needed VMEM: streamed tiles + resident weight/bias + headroom.
    # Stays well under v7x's 64 MiB (32 MiB scoped default) even with both
    # TensorCores' buffers coexisting.
    vmem_bytes = (
        n_buf * tm * (kp + npk) * itemsize      # x / out tiles (pipelined)
        + 2 * kp * npk * itemsize               # weight (conservatively 2 bufs)
        + 2 * 8 * npk * itemsize                # bias tile (padded to 8 sublanes)
        + (4 << 20)                             # compiler scratch headroom
    )
    vmem_limit = int(max(vmem_bytes, 8 << 20))

    out = pl.pallas_call(
        _linear_kernel,
        out_shape=jax.ShapeDtypeStruct((m_rows, npk), x.dtype),
        grid_spec=pltpu.PrefetchScalarGridSpec(
            num_scalar_prefetch=0,
            grid=(grid_steps,),
            in_specs=[
                _block_spec((tm, kp), lambda i: (i, 0), n_buf),   # streamed x
                pl.BlockSpec((kp, npk), lambda i: (0, 0)),        # weight: VMEM-resident
                pl.BlockSpec((1, npk), lambda i: (0, 0)),         # bias: VMEM-resident
            ],
            out_specs=_block_spec((tm, npk), lambda i: (i, 0), n_buf),
        ),
        compiler_params=pltpu.CompilerParams(
            dimension_semantics=("parallel",),   # M-tiles independent; 2 TCs on v7x
            vmem_limit_bytes=vmem_limit,
        ),
        cost_estimate=cost,
    )(x_in, w_in, b_in)

    # Packed output is a contiguous relabel of (M, d_model); reshape is free.
    return out.reshape(B, S, d_model)


if __name__ == "__main__":
    key = jax.random.PRNGKey(0)
    kx, kw, kb, kx2 = jax.random.split(key, 4)

    # Small shapes consistent with the module's forward:
    #   step_input = cat([numerical, categorical_embed], -1) -> (B, S, input_dim)
    B, S = 2, 8
    input_dim = 16       # e.g. 4 numerical + 12 categorical-embed features
    d_model = 32

    x = jax.random.normal(kx, (B, S, input_dim), dtype=jnp.float32)
    # Deterministic synthetic params (nn.Linear shapes, W pre-transposed).
    weight = jax.random.normal(kw, (input_dim, d_model), dtype=jnp.float32) * 0.05
    bias = jax.random.normal(kb, (d_model,), dtype=jnp.float32) * 0.05

    # One-time (hoisted) packing of the params, per the perf review.
    packed = prepare_time_embedding_params(weight, bias, B * S)

    # 1) Small module shapes: force the Pallas path so the kernel is exercised.
    y = jax.block_until_ready(
        time_embedding(x, weight, bias, packed=packed, force_pallas=True))
    y_ref = x @ weight + bias
    assert y.shape == (B, S, d_model)
    assert jnp.allclose(y, y_ref, atol=1e-5, rtol=1e-5)

    # Small-M fallback path (what production would use at these shapes).
    y_fb = jax.block_until_ready(time_embedding(x, weight, bias, packed=packed))
    assert jnp.allclose(y_fb, y_ref, atol=1e-5, rtol=1e-5)

    # 2) Larger M: packed weight + multi-step grid (>=2 tiles -> both v7x TCs).
    B2, S2 = 8, 4096
    x2 = jax.random.normal(kx2, (B2, S2, input_dim), dtype=jnp.float32)
    packed2 = prepare_time_embedding_params(weight, bias, B2 * S2)
    y2 = jax.block_until_ready(time_embedding(x2, weight, bias, packed=packed2))
    y2_ref = x2 @ weight + bias
    assert jnp.allclose(y2, y2_ref, atol=1e-4, rtol=1e-4)

    print("KERNEL_OK")
</pallas_src>

<mosaic_0001>
module attributes {stable_mosaic.version = 11 : i64} {
  func.func @_linear_kernel(%arg0: i32, %arg1: memref<1x256xf32, #tpu.memory_space<vmem>>, %arg2: memref<256x512xf32, #tpu.memory_space<vmem>>, %arg3: memref<1x512xf32, #tpu.memory_space<vmem>>, %arg4: memref<1x512xf32, #tpu.memory_space<vmem>>) attributes {dimension_semantics = [#tpu.dimension_semantics<parallel>], iteration_bounds = array<i64: 1>, scalar_prefetch = 0 : i64, scratch_operands = 0 : i64, tpu.core_type = #tpu.core_type<tc>, window_params = [{transform_indices = @transform_0, window_bounds = array<i64: 1, 256>}, {pipeline_mode = #tpu.pipeline_mode<synchronous>, transform_indices = @transform_1, window_bounds = array<i64: 256, 512>}, {pipeline_mode = #tpu.pipeline_mode<synchronous>, transform_indices = @transform_2, window_bounds = array<i64: 1, 512>}, {transform_indices = @transform_3, window_bounds = array<i64: 1, 512>}]} {
    %c0 = arith.constant 0 : index
    %c0_0 = arith.constant 0 : index
    %0 = vector.load %arg1[%c0, %c0_0] : memref<1x256xf32, #tpu.memory_space<vmem>>, vector<1x256xf32>
    %c0_1 = arith.constant 0 : index
    %c0_2 = arith.constant 0 : index
    %1 = vector.load %arg2[%c0_1, %c0_2] : memref<256x512xf32, #tpu.memory_space<vmem>>, vector<256x512xf32>
    %cst = arith.constant dense<0.000000e+00> : vector<1x512xf32>
    %2 = tpu.matmul %0, %1, %cst {dimension_numbers = #tpu.dot_dimension_numbers<[1], [0], [0], [1], [0, 0, 1, 1], [], []>} : vector<1x256xf32>, vector<256x512xf32>, vector<1x512xf32> -> vector<1x512xf32>
    %c0_3 = arith.constant 0 : index
    %c0_4 = arith.constant 0 : index
    %3 = vector.load %arg3[%c0_3, %c0_4] : memref<1x512xf32, #tpu.memory_space<vmem>>, vector<1x512xf32>
    %4 = arith.addf %2, %3 : vector<1x512xf32>
    %c0_5 = arith.constant 0 : index
    %c0_6 = arith.constant 0 : index
    %5 = vector.load %arg4[%c0_5, %c0_6] : memref<1x512xf32, #tpu.memory_space<vmem>>, vector<1x512xf32>
    tpu.vector_store %arg4[%c0_5, %c0_6], %4 {strides = array<i32>} : memref<1x512xf32, #tpu.memory_space<vmem>>, vector<1x512xf32>,
    return
  }
  func.func @transform_0(%arg0: i32) -> (i32, i32) {
    %c0_i32 = arith.constant 0 : i32
    %c0_i32_0 = arith.constant 0 : i32
    return %arg0, %c0_i32 : i32, i32
  }
  func.func @transform_1(%arg0: i32) -> (i32, i32) {
    %c0_i32 = arith.constant 0 : i32
    %c0_i32_0 = arith.constant 0 : i32
    %c0_i32_1 = arith.constant 0 : i32
    return %c0_i32, %c0_i32_0 : i32, i32
  }
  func.func @transform_2(%arg0: i32) -> (i32, i32) {
    %c0_i32 = arith.constant 0 : i32
    %c0_i32_0 = arith.constant 0 : i32
    %c0_i32_1 = arith.constant 0 : i32
    return %c0_i32, %c0_i32_0 : i32, i32
  }
  func.func @transform_3(%arg0: i32) -> (i32, i32) {
    %c0_i32 = arith.constant 0 : i32
    %c0_i32_0 = arith.constant 0 : i32
    return %arg0, %c0_i32 : i32, i32
  }
}

</mosaic_0001>

<bundles_post_ra>
// kernel: tpu_custom_call.1
= control target key start
LH: loop header
LB: loop body
LE: loop exit
PB: predicated region body
PF: predicated region fallthrough
CT: control target
= control target key end

     0   :  { %8 = vsyncpa [#allocation3], 0  ;;  %s547_s0 = inlined_call_operand.hbm [shape: f32[1,256], index: 0, kind: input, shape index: {}]   ;;  %s548_s1 = inlined_call_operand.hbm [shape: f32[256,512], index: 1, kind: input, shape index: {}]   ;;  %s549_s2 = inlined_call_operand.hbm [shape: f32[1,512], index: 2, kind: input, shape index: {}]   ;;  %s550_s3 = inlined_call_operand.hbm [shape: f32[1,512], index: 3, kind: output, shape index: {}]  }
   0x1   :  { %9 = vsyncpa [#allocation6], 0 }
   0x2   :  { %10 = vsyncpa [#allocation4], 0  ;;  %s499_s12 = smov [#allocation5]  }
   0x3   :  { %s26_s13 = sshll.u32 %s499_s12, 4  ;;  %s27_s13 = int_to_ptr.vmem [resolvable:$true] %s26_s13 }
   0x4   :  { %s421_s14 = scalar_lea.vmem %s27_s13, 16384  ;;  %p426_p1 = scmp.lt.s32.totalorder %s27_s13, %s27_s13 }
   0x5   :  { %p422_p0 = scmp.ne.s32.totalorder %s27_s13, %s421_s14  ;;  %p427_p2 = scmp.lt.s32.totalorder %s421_s14, %s421_s14 }
   0x7   :  { %p428_p3 = por %p427_p2, %p426_p1 }
   0x9   :  { %p429_p4 = pnand %p428_p3, %p422_p0 }
   0xb   :  { %432 = shalt.err (!%p429_p4)
}
   0xc   :  { %s500_s15 = smov 512   ;;  %s501_s16 = smov 32  }
   0xd   :  { %32 = dma.hbm_to_vmem [thread:$0]  %s548_s1, 16384, %s27_s13, [#allocation6], %s500_s15, %s500_s15, %s501_s16  }
   0xe   :  { %s502_s19 = smov [#allocation2]   ;;  %s503_s21 = smov [#allocation7]  }
   0xf   :  { %s17_s20 = sshll.u32 %s502_s19, 4  ;;  %s39_s22 = sshll.u32 %s503_s21, 4  ;;  %s18_s20 = int_to_ptr.vmem [resolvable:$true] %s17_s20  ;;  %s40_s22 = int_to_ptr.vmem [resolvable:$true] %s39_s22 }
  0x10   :  { %s441_s23 = scalar_lea.vmem %s18_s20, 32  ;;  %p446_p6 = scmp.lt.s32.totalorder %s18_s20, %s18_s20 }
  0x11   :  { %p442_p5 = scmp.ne.s32.totalorder %s18_s20, %s441_s23  ;;  %p447_p7 = scmp.lt.s32.totalorder %s441_s23, %s441_s23 }
  0x13   :  { %p448_p8 = por %p447_p7, %p446_p6 }
  0x15   :  { %p449_p9 = pnand %p448_p8, %p442_p5 }
  0x17   :  { %452 = shalt.err (!%p449_p9)
}
  0x18   :  { %20 = dma.hbm_to_vmem [thread:$0]  %s547_s0, 32, %s18_s20, [#allocation3]  }
  0x19   :  { %s461_s26 = scalar_lea.vmem %s40_s22, 64  ;;  %p466_p11 = scmp.lt.s32.totalorder %s40_s22, %s40_s22 }
  0x1a   :  { %p462_p10 = scmp.ne.s32.totalorder %s40_s22, %s461_s26  ;;  %p467_p12 = scmp.lt.s32.totalorder %s461_s26, %s461_s26 }
  0x1c   :  { %p468_p13 = por %p467_p12, %p466_p11 }
  0x1e   :  { %p469_p0 = pnand %p468_p13, %p462_p10 }
  0x20   :  { %472 = shalt.err (!%p469_p0)
}
  0x21   :  { %42 = dma.hbm_to_vmem [thread:$0]  %s549_s2, 64, %s40_s22, [#allocation6]  }
  0x22   :  { %493 = dma.done.wait [#allocation3], 32  }
  0x23   :  { %494 = vsyncadd [#allocation3], 4294967264 }
  0x24   :  { %495 = dma.done.wait [#allocation6], 16448  }
  0x25   :  { %496 = vsyncadd [#allocation6], 4294950848  ;;  %v114_v0 = vld [vmem:[#allocation5 + $0x1e8] sm:$0xff]  ;;  %v116_v1 = vld [vmem:[#allocation5 + $0x1f8] sm:$0xff]  ;;  %s505_s0 = smov [#allocation8]  }
  0x26   :  { %v113_v2 = vld [vmem:[#allocation5 + $0x1e0] sm:$0xff]  ;;  %214 = vmatprep.subr.mxu0 %v114_v0  ;;  %285 = vmatprep.subr.mxu1 %v116_v1  ;;  %v115_v3 = vld [vmem:[#allocation5 + $0x1f0] sm:$0xff]  ;;  %v110_v4 = vld [vmem:[#allocation5 + $0x1c8] sm:$0xff]  ;;  %s396_s2 = sshll.u32 %s505_s0, 4  ;;  %s397_s2 = int_to_ptr.vmem [resolvable:$true] %s396_s2 }
  0x27   :  { %v112_v5 = vld [vmem:[#allocation5 + $0x1d8] sm:$0xff]  ;;  %215 = vmatpush1.msra.mxu0 %v113_v2  ;;  %286 = vmatpush1.msra.mxu1 %v115_v3  ;;  %v109_v6 = vld [vmem:[#allocation5 + $0x1c0] sm:$0xff]  ;;  %v111_v7 = vld [vmem:[#allocation5 + $0x1d0] sm:$0xff]  ;;  %s473_s28 = scalar_lea.vmem %s397_s2, 64  ;;  %p478_p2 = scmp.lt.s32.totalorder %s397_s2, %s397_s2 }
  0x28   :  { %v106_v8 = vld [vmem:[#allocation5 + $0x1a8] sm:$0xff]  ;;  %216 = vmatprep.subr.mxu0 %v110_v4  ;;  %287 = vmatprep.subr.mxu1 %v112_v5  ;;  %v108_v9 = vld [vmem:[#allocation5 + $0x1b8] sm:$0xff]  ;;  %v105_v10 = vld [vmem:[#allocation5 + $0x1a0] sm:$0xff]  ;;  %p474_p1 = scmp.ne.s32.totalorder %s397_s2, %s473_s28  ;;  %p479_p3 = scmp.lt.s32.totalorder %s473_s28, %s473_s28 }
  0x29   :  { %v107_v11 = vld [vmem:[#allocation5 + $0x1b0] sm:$0xff]  ;;  %217 = vmatpush1.msra.mxu0 %v109_v6  ;;  %288 = vmatpush1.msra.mxu1 %v111_v7  ;;  %v102_v12 = vld [vmem:[#allocation5 + $0x188] sm:$0xff]  ;;  %v104_v13 = vld [vmem:[#allocation5 + $0x198] sm:$0xff] }
  0x2a   :  { %218 = vmatprep.subr.mxu0 %v106_v8  ;;  %289 = vmatprep.subr.mxu1 %v108_v9  ;;  %v101_v14 = vld [vmem:[#allocation5 + $0x180] sm:$0xff]  ;;  %v103_v15 = vld [vmem:[#allocation5 + $0x190] sm:$0xff]  ;;  %v98_v16 = vld [vmem:[#allocation5 + $0x168] sm:$0xff]  ;;  %p480_p4 = por %p479_p3, %p478_p2 }
  0x2b   :  { %219 = vmatpush1.msra.mxu0 %v105_v10  ;;  %290 = vmatpush1.msra.mxu1 %v107_v11  ;;  %v100_v17 = vld [vmem:[#allocation5 + $0x178] sm:$0xff]  ;;  %v97_v18 = vld [vmem:[#allocation5 + $0x160] sm:$0xff]  ;;  %v99_v19 = vld [vmem:[#allocation5 + $0x170] sm:$0xff] }
  0x2c   :  { %220 = vmatprep.subr.mxu0 %v102_v12  ;;  %291 = vmatprep.subr.mxu1 %v104_v13  ;;  %v94_v20 = vld [vmem:[#allocation5 + $0x148] sm:$0xff]  ;;  %v96_v21 = vld [vmem:[#allocation5 + $0x158] sm:$0xff]  ;;  %v93_v22 = vld [vmem:[#allocation5 + $0x140] sm:$0xff]  ;;  %p481_p5 = pnand %p480_p4, %p474_p1 }
  0x2d   :  { %221 = vmatpush1.msra.mxu0 %v101_v14  ;;  %292 = vmatpush1.msra.mxu1 %v103_v15  ;;  %v95_v23 = vld [vmem:[#allocation5 + $0x150] sm:$0xff]  ;;  %v90_v24 = vld [vmem:[#allocation5 + $0x128] sm:$0xff]  ;;  %v92_v25 = vld [vmem:[#allocation5 + $0x138] sm:$0xff] }
  0x2e   :  { %222 = vmatprep.subr.mxu0 %v98_v16  ;;  %293 = vmatprep.subr.mxu1 %v100_v17  ;;  %v89_v26 = vld [vmem:[#allocation5 + $0x120] sm:$0xff]  ;;  %v91_v27 = vld [vmem:[#allocation5 + $0x130] sm:$0xff]  ;;  %v86_v28 = vld [vmem:[#allocation5 + $0x108] sm:$0xff] }
  0x2f   :  { %223 = vmatpush1.msra.mxu0 %v97_v18  ;;  %294 = vmatpush1.msra.mxu1 %v99_v19  ;;  %v88_v29 = vld [vmem:[#allocation5 + $0x118] sm:$0xff]  ;;  %v85_v30 = vld [vmem:[#allocation5 + $0x100] sm:$0xff]  ;;  %v87_v31 = vld [vmem:[#allocation5 + $0x110] sm:$0xff] }
  0x30   :  { %224 = vmatprep.subr.mxu0 %v94_v20  ;;  %295 = vmatprep.subr.mxu1 %v96_v21  ;;  %v82_v32 = vld [vmem:[#allocation5 + $0xe8] sm:$0xff]  ;;  %v84_v33 = vld [vmem:[#allocation5 + $0xf8] sm:$0xff]  ;;  %v81_v34 = vld [vmem:[#allocation5 + $0xe0] sm:$0xff] }
  0x31   :  { %225 = vmatpush1.msra.mxu0 %v93_v22  ;;  %296 = vmatpush1.msra.mxu1 %v95_v23  ;;  %v83_v35 = vld [vmem:[#allocation5 + $0xf0] sm:$0xff]  ;;  %v78_v36 = vld [vmem:[#allocation5 + $0xc8] sm:$0xff]  ;;  %v80_v37 = vld [vmem:[#allocation5 + $0xd8] sm:$0xff] }
  0x32   :  { %226 = vmatprep.subr.mxu0 %v90_v24  ;;  %297 = vmatprep.subr.mxu1 %v92_v25  ;;  %v77_v38 = vld [vmem:[#allocation5 + $0xc0] sm:$0xff]  ;;  %v79_v39 = vld [vmem:[#allocation5 + $0xd0] sm:$0xff]  ;;  %v74_v40 = vld [vmem:[#allocation5 + $0xa8] sm:$0xff] }
  0x33   :  { %227 = vmatpush1.msra.mxu0 %v89_v26  ;;  %298 = vmatpush1.msra.mxu1 %v91_v27  ;;  %v76_v41 = vld [vmem:[#allocation5 + $0xb8] sm:$0xff]  ;;  %v73_v42 = vld [vmem:[#allocation5 + $0xa0] sm:$0xff]  ;;  %v75_v43 = vld [vmem:[#allocation5 + $0xb0] sm:$0xff] }
  0x34   :  { %228 = vmatprep.subr.mxu0 %v86_v28  ;;  %299 = vmatprep.subr.mxu1 %v88_v29  ;;  %v70_v44 = vld [vmem:[#allocation5 + $0x88] sm:$0xff]  ;;  %v72_v45 = vld [vmem:[#allocation5 + $0x98] sm:$0xff]  ;;  %v69_v46 = vld [vmem:[#allocation5 + $0x80] sm:$0xff] }
  0x35   :  { %229 = vmatpush1.msra.mxu0 %v85_v30  ;;  %300 = vmatpush1.msra.mxu1 %v87_v31  ;;  %v71_v47 = vld [vmem:[#allocation5 + $0x90] sm:$0xff]  ;;  %v66_v48 = vld [vmem:[#allocation5 + $0x68] sm:$0xff]  ;;  %v68_v49 = vld [vmem:[#allocation5 + $0x78] sm:$0xff] }
  0x36   :  { %230 = vmatprep.subr.mxu0 %v82_v32  ;;  %301 = vmatprep.subr.mxu1 %v84_v33  ;;  %v65_v50 = vld [vmem:[#allocation5 + $0x60] sm:$0xff]  ;;  %v67_v51 = vld [vmem:[#allocation5 + $0x70] sm:$0xff]  ;;  %v62_v52 = vld [vmem:[#allocation5 + $0x48] sm:$0xff] }
  0x37   :  { %231 = vmatpush1.msra.mxu0 %v81_v34  ;;  %302 = vmatpush1.msra.mxu1 %v83_v35  ;;  %v64_v53 = vld [vmem:[#allocation5 + $0x58] sm:$0xff]  ;;  %v61_v54 = vld [vmem:[#allocation5 + $0x40] sm:$0xff]  ;;  %v63_v55 = vld [vmem:[#allocation5 + $0x50] sm:$0xff] }
  0x38   :  { %232 = vmatprep.subr.mxu0 %v78_v36  ;;  %303 = vmatprep.subr.mxu1 %v80_v37  ;;  %v58_v56 = vld [vmem:[#allocation5 + $0x28] sm:$0xff]  ;;  %v60_v57 = vld [vmem:[#allocation5 + $0x38] sm:$0xff]  ;;  %v57_v58 = vld [vmem:[#allocation5 + $0x20] sm:$0xff] }
  0x39   :  { %233 = vmatpush1.msra.mxu0 %v77_v38  ;;  %304 = vmatpush1.msra.mxu1 %v79_v39  ;;  %v59_v59 = vld [vmem:[#allocation5 + $0x30] sm:$0xff]  ;;  %v54_v60 = vld [vmem:[#allocation5 + $0x8] sm:$0xff]  ;;  %v56_v61 = vld [vmem:[#allocation5 + $0x18] sm:$0xff]  ;;  %v183_v38 = vlaneseq }
  0x3a   :  { %234 = vmatprep.subr.mxu0 %v74_v40  ;;  %305 = vmatprep.subr.mxu1 %v76_v41  ;;  %v53_v62 = vld [vmem:[#allocation5] sm:$0xff]  ;;  %v55_v63 = vld [vmem:[#allocation5 + $0x10] sm:$0xff]  ;;  %v178_v0 = vld [vmem:[#allocation5 + $0x3e8] sm:$0xff] }
  0x3b   :  { %235 = vmatpush1.msra.mxu0 %v73_v42  ;;  %306 = vmatpush1.msra.mxu1 %v75_v43  ;;  %v180_v1 = vld [vmem:[#allocation5 + $0x3f8] sm:$0xff]  ;;  %v177_v2 = vld [vmem:[#allocation5 + $0x3e0] sm:$0xff]  ;;  %v179_v3 = vld [vmem:[#allocation5 + $0x3f0] sm:$0xff]  ;;  %vm387_vm0 = vcmp.lt.s32.totalorder %v183_v38, 512 }
  0x3c   :  { %236 = vmatprep.subr.mxu0 %v70_v44  ;;  %307 = vmatprep.subr.mxu1 %v72_v45  ;;  %v174_v4 = vld [vmem:[#allocation5 + $0x3c8] sm:$0xff]  ;;  %v176_v5 = vld [vmem:[#allocation5 + $0x3d8] sm:$0xff]  ;;  %v173_v6 = vld [vmem:[#allocation5 + $0x3c0] sm:$0xff] }
  0x3d   :  { %237 = vmatpush1.msra.mxu0 %v69_v46  ;;  %308 = vmatpush1.msra.mxu1 %v71_v47  ;;  %v175_v7 = vld [vmem:[#allocation5 + $0x3d0] sm:$0xff]  ;;  %v170_v8 = vld [vmem:[#allocation5 + $0x3a8] sm:$0xff]  ;;  %v172_v9 = vld [vmem:[#allocation5 + $0x3b8] sm:$0xff]  ;;  %v536_v47 = vshrl.u32 %v183_v38, 7 }
  0x3e   :  { %238 = vmatprep.subr.mxu0 %v66_v48  ;;  %309 = vmatprep.subr.mxu1 %v68_v49  ;;  %v169_v10 = vld [vmem:[#allocation5 + $0x3a0] sm:$0xff]  ;;  %v171_v11 = vld [vmem:[#allocation5 + $0x3b0] sm:$0xff]  ;;  %v166_v12 = vld [vmem:[#allocation5 + $0x388] sm:$0xff] }
  0x3f   :  { %239 = vmatpush1.msra.mxu0 %v65_v50  ;;  %310 = vmatpush1.msra.mxu1 %v67_v51  ;;  %v168_v13 = vld [vmem:[#allocation5 + $0x398] sm:$0xff]  ;;  %v165_v14 = vld [vmem:[#allocation5 + $0x380] sm:$0xff]  ;;  %v167_v15 = vld [vmem:[#allocation5 + $0x390] sm:$0xff] }
  0x40   :  { %240 = vmatprep.subr.mxu0 %v62_v52  ;;  %311 = vmatprep.subr.mxu1 %v64_v53  ;;  %v162_v16 = vld [vmem:[#allocation5 + $0x368] sm:$0xff]  ;;  %v164_v17 = vld [vmem:[#allocation5 + $0x378] sm:$0xff]  ;;  %v161_v18 = vld [vmem:[#allocation5 + $0x360] sm:$0xff] }
  0x41   :  { %241 = vmatpush1.msra.mxu0 %v61_v54  ;;  %312 = vmatpush1.msra.mxu1 %v63_v55  ;;  %v163_v19 = vld [vmem:[#allocation5 + $0x370] sm:$0xff]  ;;  %v158_v20 = vld [vmem:[#allocation5 + $0x348] sm:$0xff]  ;;  %v160_v21 = vld [vmem:[#allocation5 + $0x358] sm:$0xff] }
  0x42   :  { %242 = vmatprep.subr.mxu0 %v58_v56  ;;  %313 = vmatprep.subr.mxu1 %v60_v57  ;;  %v157_v22 = vld [vmem:[#allocation5 + $0x340] sm:$0xff]  ;;  %v159_v23 = vld [vmem:[#allocation5 + $0x350] sm:$0xff]  ;;  %v154_v24 = vld [vmem:[#allocation5 + $0x328] sm:$0xff]  ;;  %v189_v56 = vsub.s32 1, %v536_v47 }
  0x43   :  { %243 = vmatpush1.msra.mxu0 %v57_v58  ;;  %314 = vmatpush1.msra.mxu1 %v59_v59  ;;  %v156_v25 = vld [vmem:[#allocation5 + $0x338] sm:$0xff]  ;;  %v153_v26 = vld [vmem:[#allocation5 + $0x320] sm:$0xff]  ;;  %v155_v27 = vld [vmem:[#allocation5 + $0x330] sm:$0xff] }
  0x44   :  { %244 = vmatprep.subr.mxu0 %v54_v60  ;;  %315 = vmatprep.subr.mxu1 %v56_v61  ;;  %v150_v28 = vld [vmem:[#allocation5 + $0x308] sm:$0xff]  ;;  %v152_v29 = vld [vmem:[#allocation5 + $0x318] sm:$0xff]  ;;  %v149_v30 = vld [vmem:[#allocation5 + $0x300] sm:$0xff] }
  0x45   :  { %245 = vmatpush1.msra.mxu0 %v53_v62  ;;  %316 = vmatpush1.msra.mxu1 %v55_v63  ;;  %v151_v31 = vld [vmem:[#allocation5 + $0x310] sm:$0xff]  ;;  %v146_v32 = vld [vmem:[#allocation5 + $0x2e8] sm:$0xff]  ;;  %v148_v33 = vld [vmem:[#allocation5 + $0x2f8] sm:$0xff]  ;;  %v185_v62 = vsub.s32 0, %v536_v47 }
  0x46   :  { %246 = vmatprep.subr.mxu0 %v178_v0  ;;  %317 = vmatprep.subr.mxu1 %v180_v1  ;;  %v145_v34 = vld [vmem:[#allocation5 + $0x2e0] sm:$0xff]  ;;  %v147_v35 = vld [vmem:[#allocation5 + $0x2f0] sm:$0xff]  ;;  %v142_v36 = vld [vmem:[#allocation5 + $0x2c8] sm:$0xff] }
  0x47   :  { %247 = vmatpush2.msra.mxu0 %v177_v2  ;;  %318 = vmatpush2.msra.mxu1 %v179_v3  ;;  %v144_v37 = vld [vmem:[#allocation5 + $0x2d8] sm:$0xff]  ;;  %v141_v39 = vld [vmem:[#allocation5 + $0x2c0] sm:$0xff]  ;;  %v143_v40 = vld [vmem:[#allocation5 + $0x2d0] sm:$0xff] }
  0x48   :  { %248 = vmatprep.subr.mxu0 %v174_v4  ;;  %319 = vmatprep.subr.mxu1 %v176_v5  ;;  %v138_v41 = vld [vmem:[#allocation5 + $0x2a8] sm:$0xff]  ;;  %v140_v42 = vld [vmem:[#allocation5 + $0x2b8] sm:$0xff]  ;;  %v137_v43 = vld [vmem:[#allocation5 + $0x2a0] sm:$0xff] }
  0x49   :  { %249 = vmatpush2.msra.mxu0 %v173_v6  ;;  %320 = vmatpush2.msra.mxu1 %v175_v7  ;;  %v139_v44 = vld [vmem:[#allocation5 + $0x2b0] sm:$0xff]  ;;  %v134_v45 = vld [vmem:[#allocation5 + $0x288] sm:$0xff]  ;;  %v136_v46 = vld [vmem:[#allocation5 + $0x298] sm:$0xff]  ;;  %v504_v7 = vmov 1966171168  }
  0x4a   :  { %250 = vmatprep.subr.mxu0 %v170_v8  ;;  %321 = vmatprep.subr.mxu1 %v172_v9  ;;  %v133_v48 = vld [vmem:[#allocation5 + $0x280] sm:$0xff]  ;;  %v135_v49 = vld [vmem:[#allocation5 + $0x290] sm:$0xff]  ;;  %v130_v50 = vld [vmem:[#allocation5 + $0x268] sm:$0xff]  ;;  %v363_v8 = vunpack.c.l.s4 %v504_v7  ;;  %v204_v9 = vsub.s32 2, %v536_v47 }
  0x4b   :  { %251 = vmatpush2.msra.mxu0 %v169_v10  ;;  %322 = vmatpush2.msra.mxu1 %v171_v11  ;;  %v132_v51 = vld [vmem:[#allocation5 + $0x278] sm:$0xff]  ;;  %v129_v52 = vld [vmem:[#allocation5 + $0x260] sm:$0xff]  ;;  %v131_v53 = vld [vmem:[#allocation5 + $0x270] sm:$0xff]  ;;  %v208_v10 = vsub.s32 3, %v536_v47 }
  0x4c   :  { %252 = vmatprep.subr.mxu0 %v166_v12  ;;  %323 = vmatprep.subr.mxu1 %v168_v13  ;;  %v126_v54 = vld [vmem:[#allocation5 + $0x248] sm:$0xff]  ;;  %v128_v55 = vld [vmem:[#allocation5 + $0x258] sm:$0xff]  ;;  %v125_v57 = vld [vmem:[#allocation5 + $0x240] sm:$0xff]  ;;  %v364_v12 = vunpack.c.0.s8 %v363_v8 }
  0x4d   :  { %253 = vmatpush2.msra.mxu0 %v165_v14  ;;  %324 = vmatpush2.msra.mxu1 %v167_v15  ;;  %v127_v58 = vld [vmem:[#allocation5 + $0x250] sm:$0xff]  ;;  %v52_v59 = vld [vmem:[#allocation2] sm:$0x3]  ;;  %v122_v60 = vld [vmem:[#allocation5 + $0x228] sm:$0xff] }
  0x4e   :  { %254 = vmatprep.subr.mxu0 %v162_v16  ;;  %325 = vmatprep.subr.mxu1 %v164_v17  ;;  %v124_v61 = vld [vmem:[#allocation5 + $0x238] sm:$0xff]  ;;  %v121_v63 = vld [vmem:[#allocation5 + $0x220] sm:$0xff]  ;;  %v123_v0 = vld [vmem:[#allocation5 + $0x230] sm:$0xff]  ;;  %v190_v3 = vrot.slane %v52_v59, %v189_v56  ;;  %v186_v5 = vrot.slane %v52_v59, %v185_v62 }
  0x4f   :  { %255 = vmatpush2.msra.mxu0 %v161_v18  ;;  %326 = vmatpush2.msra.mxu1 %v163_v19  ;;  %v118_v1 = vld [vmem:[#allocation5 + $0x208] sm:$0xff]  ;;  %v120_v2 = vld [vmem:[#allocation5 + $0x218] sm:$0xff]  ;;  %v117_v4 = vld [vmem:[#allocation5 + $0x200] sm:$0xff] }
  0x50   :  { %256 = vmatprep.subr.mxu0 %v158_v20  ;;  %327 = vmatprep.subr.mxu1 %v160_v21  ;;  %v119_v6 = vld [vmem:[#allocation5 + $0x210] sm:$0xff]  ;;  %v181_v11 = vld [vmem:[#allocation7] sm:$0xf]  ;;  %v367_v20 = vsub.s32 %v364_v12, %v536_v47 }
  0x51   :  { %257 = vmatpush2.msra.mxu0 %v157_v22  ;;  %328 = vmatpush2.msra.mxu1 %v159_v23  ;;  %v197_v13 = vrot.slane %v181_v11, %v185_v62  ;;  %v205_v14 = vrot.slane %v181_v11, %v204_v9  ;;  %v201_v15 = vrot.slane %v181_v11, %v189_v56 }
  0x52   :  { %258 = vmatprep.subr.mxu0 %v154_v24  ;;  %329 = vmatprep.subr.mxu1 %v156_v25  ;;  %v209_v16 = vrot.slane %v181_v11, %v208_v10 }
  0x53   :  { %259 = vmatpush2.msra.mxu0 %v153_v26  ;;  %330 = vmatpush2.msra.mxu1 %v155_v27 }
  0x54   :  { %260 = vmatprep.subr.mxu0 %v150_v28  ;;  %331 = vmatprep.subr.mxu1 %v152_v29 }
  0x55   :  { %261 = vmatpush2.msra.mxu0 %v149_v30  ;;  %332 = vmatpush2.msra.mxu1 %v151_v31 }
  0x56   :  { %262 = vmatprep.subr.mxu0 %v146_v32  ;;  %333 = vmatprep.subr.mxu1 %v148_v33 }
  0x57   :  { %263 = vmatpush2.msra.mxu0 %v145_v34  ;;  %334 = vmatpush2.msra.mxu1 %v147_v35 }
  0x58   :  { %264 = vmatprep.subr.mxu0 %v142_v36  ;;  %335 = vmatprep.subr.mxu1 %v144_v37 }
  0x59   :  { %265 = vmatpush2.msra.mxu0 %v141_v39  ;;  %336 = vmatpush2.msra.mxu1 %v143_v40 }
  0x5a   :  { %266 = vmatprep.subr.mxu0 %v138_v41  ;;  %337 = vmatprep.subr.mxu1 %v140_v42 }
  0x5b   :  { %267 = vmatpush2.msra.mxu0 %v137_v43  ;;  %338 = vmatpush2.msra.mxu1 %v139_v44 }
  0x5c   :  { %268 = vmatprep.subr.mxu0 %v134_v45  ;;  %339 = vmatprep.subr.mxu1 %v136_v46 }
  0x5d   :  { %269 = vmatpush2.msra.mxu0 %v133_v48  ;;  %340 = vmatpush2.msra.mxu1 %v135_v49 }
  0x5e   :  { %270 = vmatprep.subr.mxu0 %v130_v50  ;;  %341 = vmatprep.subr.mxu1 %v132_v51 }
  0x5f   :  { %271 = vmatpush2.msra.mxu0 %v129_v52  ;;  %342 = vmatpush2.msra.mxu1 %v131_v53 }
  0x60   :  { %272 = vmatprep.subr.mxu0 %v126_v54  ;;  %343 = vmatprep.subr.mxu1 %v128_v55 }
  0x61   :  { %273 = vmatpush2.msra.mxu0 %v125_v57  ;;  %344 = vmatpush2.msra.mxu1 %v127_v58 }
  0x62   :  { %274 = vmatprep.subr.mxu0 %v122_v60  ;;  %345 = vmatprep.subr.mxu1 %v124_v61 }
  0x63   :  { %275 = vmatpush2.msra.mxu0 %v121_v63  ;;  %346 = vmatpush2.msra.mxu1 %v123_v0 }
  0x64   :  { %276 = vmatprep.subr.mxu0 %v118_v1  ;;  %347 = vmatprep.subr.mxu1 %v120_v2 }
  0x65   :  { %277 = vmatpush2.msra.mxu0 %v117_v4  ;;  %278 = vmatprep.mubr.f32.mxu0 %v190_v3 }
  0x66   :  { %348 = vmatpush2.msra.mxu1 %v119_v6  ;;  %349 = vmatprep.mubr.f32.mxu1 %v190_v3 }
  0x67   :  { %279 = vmatmul.mubr.f32.vlgmr.msra.gmra.mxu0 %v186_v5  ;;  %350 = vmatmul.mubr.f32.vlgmr.msra.gmra.mxu1 %v186_v5 }
 0x127   :  { %v280_v17 = vpop.f32.mrf.mxu0  ;;  %v351_v18 = vpop.f32.mrf.mxu1 }
 0x128   :  { %v281_v22 = vadd.f32 %v280_v17, %v197_v13  ;;  %v352_v23 = vadd.f32 %v351_v18, %v205_v14 }
 0x129   :  { %v282_v19 = vpop.f32.mrf.mxu0  ;;  %v353_v21 = vpop.f32.mrf.mxu1 }
 0x12a   :  { %v283_v24 = vadd.f32 %v282_v19, %v201_v15  ;;  %v354_v25 = vadd.f32 %v353_v21, %v209_v16 }
 0x12c   :  { %v360_v26 = vcombine.low %v281_v22, %v283_v24  ;;  %v361_v27 = vcombine.low %v352_v23, %v354_v25 }
 0x12e   :  { %v368_v28 = vrot.slane %v360_v26, %v367_v20  ;;  %v375_v29 = vrot.slane %v361_v27, %v367_v20 }
 0x130   :  { %v376_v30 = vcombine.low %v368_v28, %v375_v29 }
 0x132   :  { %v383_v31 = vrot.slane %v376_v30, %v367_v20 }
 0x134   :  { %389 = vst.msk [vmem:[#allocation8] sm:$0xf] %vm387_vm0, %v383_v31 }
 0x135   :  { %484 = shalt.err (!%p481_p5)
}
 0x136   :  { %399 = dma.vmem_to_hbm [thread:$0]  %s397_s2, 64, %s550_s3, [#allocation4]  }
 0x137   :  { %497 = dma.done.wait [#allocation4], 64  }
 0x138   :  { %498 = vsyncadd [#allocation4], 4294967232 }
 0x139   :  { %403 = vsyncpa [#allocation3], 1 }
 0x13a   :  { %404 = vsyncpa [#allocation6], 1 }
 0x13b   :  { %405 = vsyncpa [#allocation4], 1 }

</bundles_post_ra>
